<compile_context>
chip_gen: v7x
topology: tpu7x:2x2x1
jax: 0.10.0
libtpu: 0.0.40
codegen_flags: <defaults>
</compile_context>

<pallas_src>
import jax
import jax.numpy as jnp
from jax import lax
from jax.experimental import pallas as pl
from jax.experimental.pallas import tpu as pltpu


def mlp_kernel(x_ref, w1_ref, b1_ref, w2_ref, b2_ref,
               w3_ref, b3_ref, w4_ref, b4_ref, o_ref):
    # x_ref: (TILE_B, 8) f32 batch-major tile (no wrapper transpose).
    # w1..w3: bf16 (out, in); b1..b3: f32 (out, 1); w4: f32 (64, 1);
    # b4: f32 (1, 1) scalar in SMEM.  o_ref: (1, TILE_B) lane-dense.
    x = x_ref[...].astype(jnp.bfloat16)                        # (tb, 8) bf16

    # Layer 1: contract the feature dim of both operands -> (64, tb), i.e.
    # batch lands on the lane dimension without any on-/off-chip transpose.
    h = lax.dot_general(w1_ref[...], x,
                        dimension_numbers=(((1,), (1,)), ((), ())),
                        preferred_element_type=jnp.float32)
    h = jnp.maximum(h + b1_ref[...], 0.0)                      # f32 (64, tb)

    # Layers 2-3: bf16 operands, f32 accumulation, bias/ReLU in f32.
    h = jnp.dot(w2_ref[...], h.astype(jnp.bfloat16),
                preferred_element_type=jnp.float32)
    h = jnp.maximum(h + b2_ref[...], 0.0)                      # (64, tb)

    h = jnp.dot(w3_ref[...], h.astype(jnp.bfloat16),
                preferred_element_type=jnp.float32)
    h = jnp.maximum(h + b3_ref[...], 0.0)                      # (64, tb)

    # Final 64 -> 1 layer on the VPU/XLU (broadcast-multiply + sublane reduce)
    # instead of an M=1 MXU matmul; scalar bias comes from SMEM.
    z = jnp.sum(w4_ref[...] * h, axis=0, keepdims=True) + b4_ref[0, 0]
    o_ref[...] = jax.nn.sigmoid(z)                             # (1, tb)


def _round_up(v, m):
    return ((v + m - 1) // m) * m


def _pick_tiles(B, tile_b):
    """Lane-aligned (multiple-of-128) batch tile.

    For large batches we force at least 2 grid steps so the single
    ("parallel",) grid axis can be sharded across both v7x TensorCores.
    """
    b128 = _round_up(B, 128)
    if b128 <= 256:                       # tiny batch: a single tile
        tb = b128
    else:
        n_steps = max(pl.cdiv(B, tile_b), 2)
        tb = _round_up(pl.cdiv(B, n_steps), 128)
    Bp = _round_up(B, tb)
    return tb, Bp


def binary_classifier_forward(x, params, *, tile_b=8192):
    """x: (B, 8) float32; params: PyTorch-shaped weights. Returns (B, 1) float32."""
    B = x.shape[0]
    tb, Bp = _pick_tiles(B, tile_b)
    if Bp != B:
        # Zero-filled padded rows; sliced off after the kernel.
        x = jnp.pad(x, ((0, Bp - B), (0, 0)))

    # Matmul weights in bf16 (MXU operands); everything else stays f32.
    w1 = params["w1"].astype(jnp.bfloat16)                    # (64, 8)
    w2 = params["w2"].astype(jnp.bfloat16)                    # (64, 64)
    w3 = params["w3"].astype(jnp.bfloat16)                    # (64, 64)
    b1 = params["b1"].reshape(64, 1).astype(jnp.float32)
    b2 = params["b2"].reshape(64, 1).astype(jnp.float32)
    b3 = params["b3"].reshape(64, 1).astype(jnp.float32)
    w4 = params["w4"].reshape(64, 1).astype(jnp.float32)      # (1,64) -> column, f32
    b4 = params["b4"].reshape(1, 1).astype(jnp.float32)

    def const_spec(shape):
        # Full-array block, constant index_map -> VMEM-resident across grid steps.
        return pl.BlockSpec(shape, lambda i: (0, 0))

    out = pl.pallas_call(
        mlp_kernel,
        out_shape=jax.ShapeDtypeStruct((1, Bp), jnp.float32),
        grid=(Bp // tb,),
        in_specs=[
            pl.BlockSpec((tb, 8), lambda i: (i, 0)),          # streamed batch tile
            const_spec((64, 8)),  const_spec((64, 1)),        # w1, b1
            const_spec((64, 64)), const_spec((64, 1)),        # w2, b2
            const_spec((64, 64)), const_spec((64, 1)),        # w3, b3
            const_spec((64, 1)),                              # w4 (column, f32)
            pl.BlockSpec(memory_space=pltpu.MemorySpace.SMEM),  # b4 scalar
        ],
        out_specs=pl.BlockSpec((1, tb), lambda i: (0, i)),    # lane-dense output slab
        compiler_params=pltpu.CompilerParams(
            dimension_semantics=("parallel",)),               # megacore on v7x
    )(x, w1, b1, w2, b2, w3, b3, w4, b4)

    # Back to PyTorch layout (B, 1).
    return out[0, :B].reshape(B, 1)


def init_params(key):
    """PyTorch nn.Linear default init: U[-1/sqrt(fan_in), +1/sqrt(fan_in)].

    Weights stored as (out_features, in_features), biases as (out_features,),
    exactly mirroring the torch module's parameter shapes.
    """
    dims = [(8, 64), (64, 64), (64, 64), (64, 1)]
    params = {}
    keys = jax.random.split(key, 2 * len(dims))
    for i, (fan_in, fan_out) in enumerate(dims):
        bound = 1.0 / (fan_in ** 0.5)
        w = jax.random.uniform(keys[2 * i], (fan_out, fan_in),
                               dtype=jnp.float32, minval=-bound, maxval=bound)
        b = jax.random.uniform(keys[2 * i + 1], (fan_out,),
                               dtype=jnp.float32, minval=-bound, maxval=bound)
        params[f"w{i + 1}"] = w
        params[f"b{i + 1}"] = b
    return params


def reference_forward(x, params):
    """Pure-JAX f32 reference (PyTorch semantics: x @ W.T + b)."""
    h = jnp.maximum(x @ params["w1"].T + params["b1"], 0.0)
    h = jnp.maximum(h @ params["w2"].T + params["b2"], 0.0)
    h = jnp.maximum(h @ params["w3"].T + params["b3"], 0.0)
    return jax.nn.sigmoid(h @ params["w4"].T + params["b4"])


if __name__ == "__main__":
    key = jax.random.PRNGKey(0)
    pkey, xkey = jax.random.split(key)

    params = init_params(pkey)
    B = 8
    x = jax.random.normal(xkey, (B, 8), dtype=jnp.float32)

    out = binary_classifier_forward(x, params)
    out = jax.block_until_ready(out)

    ref = reference_forward(x, params)
    assert out.shape == (B, 1)
    # bf16 MXU operands -> tolerance loosened vs the all-f32 version.
    assert jnp.allclose(out, ref, atol=2e-2, rtol=2e-2), (
        f"max abs err {jnp.max(jnp.abs(out - ref))}")

    print("KERNEL_OK")
</pallas_src>

<mosaic_0001>
module attributes {stable_mosaic.version = 11 : i64} {
  func.func @mlp_kernel(%arg0: i32, %arg1: memref<128x8xf32, #tpu.memory_space<vmem>>, %arg2: memref<64x8xbf16, #tpu.memory_space<vmem>>, %arg3: memref<64x1xf32, #tpu.memory_space<vmem>>, %arg4: memref<64x64xbf16, #tpu.memory_space<vmem>>, %arg5: memref<64x1xf32, #tpu.memory_space<vmem>>, %arg6: memref<64x64xbf16, #tpu.memory_space<vmem>>, %arg7: memref<64x1xf32, #tpu.memory_space<vmem>>, %arg8: memref<64x1xf32, #tpu.memory_space<vmem>>, %arg9: memref<1x1xf32, #tpu.memory_space<smem>>, %arg10: memref<1x128xf32, #tpu.memory_space<vmem>>) attributes {dimension_semantics = [#tpu.dimension_semantics<parallel>], iteration_bounds = array<i64: 1>, scalar_prefetch = 0 : i64, scratch_operands = 0 : i64, tpu.core_type = #tpu.core_type<tc>, window_params = [{transform_indices = @transform_0, window_bounds = array<i64: 128, 8>}, {pipeline_mode = #tpu.pipeline_mode<synchronous>, transform_indices = @transform_1, window_bounds = array<i64: 64, 8>}, {pipeline_mode = #tpu.pipeline_mode<synchronous>, transform_indices = @transform_2, window_bounds = array<i64: 64, 1>}, {pipeline_mode = #tpu.pipeline_mode<synchronous>, transform_indices = @transform_3, window_bounds = array<i64: 64, 64>}, {pipeline_mode = #tpu.pipeline_mode<synchronous>, transform_indices = @transform_4, window_bounds = array<i64: 64, 1>}, {pipeline_mode = #tpu.pipeline_mode<synchronous>, transform_indices = @transform_5, window_bounds = array<i64: 64, 64>}, {pipeline_mode = #tpu.pipeline_mode<synchronous>, transform_indices = @transform_6, window_bounds = array<i64: 64, 1>}, {pipeline_mode = #tpu.pipeline_mode<synchronous>, transform_indices = @transform_7, window_bounds = array<i64: 64, 1>}, {transform_indices = @transform_8, window_bounds = array<i64: 1, 1>}, {transform_indices = @transform_9, window_bounds = array<i64: 1, 128>}]} {
    %c0 = arith.constant 0 : index
    %c0_0 = arith.constant 0 : index
    %0 = vector.load %arg1[%c0, %c0_0] : memref<128x8xf32, #tpu.memory_space<vmem>>, vector<128x8xf32>
    %1 = arith.truncf %0 : vector<128x8xf32> to vector<128x8xbf16>
    %c0_1 = arith.constant 0 : index
    %c0_2 = arith.constant 0 : index
    %2 = vector.load %arg2[%c0_1, %c0_2] : memref<64x8xbf16, #tpu.memory_space<vmem>>, vector<64x8xbf16>
    %cst = arith.constant dense<0.000000e+00> : vector<64x128xf32>
    %3 = tpu.matmul %2, %1, %cst {dimension_numbers = #tpu.dot_dimension_numbers<[1], [1], [0], [0], [0, 0, 1, 0], [], []>} : vector<64x8xbf16>, vector<128x8xbf16>, vector<64x128xf32> -> vector<64x128xf32>
    %c0_3 = arith.constant 0 : index
    %c0_4 = arith.constant 0 : index
    %4 = vector.load %arg3[%c0_3, %c0_4] : memref<64x1xf32, #tpu.memory_space<vmem>>, vector<64x1xf32>
    %5 = vector.broadcast %4 : vector<64x1xf32> to vector<64x128xf32>
    %6 = arith.addf %3, %5 : vector<64x128xf32>
    %cst_5 = arith.constant 0.000000e+00 : f32
    %7 = vector.broadcast %cst_5 : f32 to vector<64x128xf32>
    %8 = arith.maximumf %6, %7 : vector<64x128xf32>
    %c0_6 = arith.constant 0 : index
    %c0_7 = arith.constant 0 : index
    %9 = vector.load %arg4[%c0_6, %c0_7] : memref<64x64xbf16, #tpu.memory_space<vmem>>, vector<64x64xbf16>
    %10 = arith.truncf %8 : vector<64x128xf32> to vector<64x128xbf16>
    %cst_8 = arith.constant dense<0.000000e+00> : vector<64x128xf32>
    %11 = tpu.matmul %9, %10, %cst_8 {dimension_numbers = #tpu.dot_dimension_numbers<[1], [0], [0], [1], [0, 0, 1, 1], [], []>} : vector<64x64xbf16>, vector<64x128xbf16>, vector<64x128xf32> -> vector<64x128xf32>
    %c0_9 = arith.constant 0 : index
    %c0_10 = arith.constant 0 : index
    %12 = vector.load %arg5[%c0_9, %c0_10] : memref<64x1xf32, #tpu.memory_space<vmem>>, vector<64x1xf32>
    %13 = vector.broadcast %12 : vector<64x1xf32> to vector<64x128xf32>
    %14 = arith.addf %11, %13 : vector<64x128xf32>
    %cst_11 = arith.constant 0.000000e+00 : f32
    %15 = vector.broadcast %cst_11 : f32 to vector<64x128xf32>
    %16 = arith.maximumf %14, %15 : vector<64x128xf32>
    %c0_12 = arith.constant 0 : index
    %c0_13 = arith.constant 0 : index
    %17 = vector.load %arg6[%c0_12, %c0_13] : memref<64x64xbf16, #tpu.memory_space<vmem>>, vector<64x64xbf16>
    %18 = arith.truncf %16 : vector<64x128xf32> to vector<64x128xbf16>
    %cst_14 = arith.constant dense<0.000000e+00> : vector<64x128xf32>
    %19 = tpu.matmul %17, %18, %cst_14 {dimension_numbers = #tpu.dot_dimension_numbers<[1], [0], [0], [1], [0, 0, 1, 1], [], []>} : vector<64x64xbf16>, vector<64x128xbf16>, vector<64x128xf32> -> vector<64x128xf32>
    %c0_15 = arith.constant 0 : index
    %c0_16 = arith.constant 0 : index
    %20 = vector.load %arg7[%c0_15, %c0_16] : memref<64x1xf32, #tpu.memory_space<vmem>>, vector<64x1xf32>
    %21 = vector.broadcast %20 : vector<64x1xf32> to vector<64x128xf32>
    %22 = arith.addf %19, %21 : vector<64x128xf32>
    %cst_17 = arith.constant 0.000000e+00 : f32
    %23 = vector.broadcast %cst_17 : f32 to vector<64x128xf32>
    %24 = arith.maximumf %22, %23 : vector<64x128xf32>
    %c0_18 = arith.constant 0 : index
    %c0_19 = arith.constant 0 : index
    %25 = vector.load %arg8[%c0_18, %c0_19] : memref<64x1xf32, #tpu.memory_space<vmem>>, vector<64x1xf32>
    %26 = vector.broadcast %25 : vector<64x1xf32> to vector<64x128xf32>
    %27 = arith.mulf %26, %24 : vector<64x128xf32>
    %cst_20 = arith.constant dense<0.000000e+00> : vector<128xf32>
    %28 = vector.multi_reduction <add>, %27, %cst_20 [0] : vector<64x128xf32> to vector<128xf32>
    %29 = vector.shape_cast %28 : vector<128xf32> to vector<1x128xf32>
    %c0_21 = arith.constant 0 : index
    %c0_22 = arith.constant 0 : index
    %30 = memref.load %arg9[%c0_21, %c0_22] : memref<1x1xf32, #tpu.memory_space<smem>>
    %31 = vector.broadcast %30 : f32 to vector<1x128xf32>
    %32 = arith.addf %29, %31 : vector<1x128xf32>
    %33 = arith.negf %32 : vector<1x128xf32>
    %34 = math.exp %33 : vector<1x128xf32>
    %cst_23 = arith.constant 1.000000e+00 : f32
    %35 = vector.broadcast %cst_23 : f32 to vector<1x128xf32>
    %36 = arith.addf %35, %34 : vector<1x128xf32>
    %37 = arith.divf %35, %36 : vector<1x128xf32>
    %c0_24 = arith.constant 0 : index
    %c0_25 = arith.constant 0 : index
    %38 = vector.load %arg10[%c0_24, %c0_25] : memref<1x128xf32, #tpu.memory_space<vmem>>, vector<1x128xf32>
    tpu.vector_store %arg10[%c0_24, %c0_25], %37 {strides = array<i32>} : memref<1x128xf32, #tpu.memory_space<vmem>>, vector<1x128xf32>,
    return
  }
  func.func @transform_0(%arg0: i32) -> (i32, i32) {
    %c0_i32 = arith.constant 0 : i32
    %c0_i32_0 = arith.constant 0 : i32
    return %arg0, %c0_i32 : i32, i32
  }
  func.func @transform_1(%arg0: i32) -> (i32, i32) {
    %c0_i32 = arith.constant 0 : i32
    %c0_i32_0 = arith.constant 0 : i32
    %c0_i32_1 = arith.constant 0 : i32
    return %c0_i32, %c0_i32_0 : i32, i32
  }
  func.func @transform_2(%arg0: i32) -> (i32, i32) {
    %c0_i32 = arith.constant 0 : i32
    %c0_i32_0 = arith.constant 0 : i32
    %c0_i32_1 = arith.constant 0 : i32
    return %c0_i32, %c0_i32_0 : i32, i32
  }
  func.func @transform_3(%arg0: i32) -> (i32, i32) {
    %c0_i32 = arith.constant 0 : i32
    %c0_i32_0 = arith.constant 0 : i32
    %c0_i32_1 = arith.constant 0 : i32
    return %c0_i32, %c0_i32_0 : i32, i32
  }
  func.func @transform_4(%arg0: i32) -> (i32, i32) {
    %c0_i32 = arith.constant 0 : i32
    %c0_i32_0 = arith.constant 0 : i32
    %c0_i32_1 = arith.constant 0 : i32
    return %c0_i32, %c0_i32_0 : i32, i32
  }
  func.func @transform_5(%arg0: i32) -> (i32, i32) {
    %c0_i32 = arith.constant 0 : i32
    %c0_i32_0 = arith.constant 0 : i32
    %c0_i32_1 = arith.constant 0 : i32
    return %c0_i32, %c0_i32_0 : i32, i32
  }
  func.func @transform_6(%arg0: i32) -> (i32, i32) {
    %c0_i32 = arith.constant 0 : i32
    %c0_i32_0 = arith.constant 0 : i32
    %c0_i32_1 = arith.constant 0 : i32
    return %c0_i32, %c0_i32_0 : i32, i32
  }
  func.func @transform_7(%arg0: i32) -> (i32, i32) {
    %c0_i32 = arith.constant 0 : i32
    %c0_i32_0 = arith.constant 0 : i32
    %c0_i32_1 = arith.constant 0 : i32
    return %c0_i32, %c0_i32_0 : i32, i32
  }
  func.func @transform_8(%arg0: i32) -> (i32, i32) {
    %c0_i32 = arith.constant 0 : i32
    %c0_i32_0 = arith.constant 0 : i32
    %c0_i32_1 = arith.constant 0 : i32
    return %c0_i32, %c0_i32_0 : i32, i32
  }
  func.func @transform_9(%arg0: i32) -> (i32, i32) {
    %c0_i32 = arith.constant 0 : i32
    %c0_i32_0 = arith.constant 0 : i32
    return %c0_i32, %arg0 : i32, i32
  }
}

</mosaic_0001>

<bundles_post_ra>
// kernel: tpu_custom_call.1
= control target key start
LH: loop header
LB: loop body
LE: loop exit
PB: predicated region body
PF: predicated region fallthrough
CT: control target
= control target key end

     0   :  { %vm135_vm0 = vcmask 64512   ;;  %v830_v5 = vmov 0   ;;  %s1105_s0 = inlined_call_operand.vmem [shape: f32[128,8], index: 0, kind: input, shape index: {}]   ;;  %s1106_s1 = inlined_call_operand.vmem [shape: bf16[64,8], index: 1, kind: input, shape index: {}]   ;;  %s1107_s2 = inlined_call_operand.vmem [shape: f32[64,1], index: 2, kind: input, shape index: {}]   ;;  %s1108_s3 = inlined_call_operand.vmem [shape: bf16[64,64], index: 3, kind: input, shape index: {}]   ;;  %s1109_s4 = inlined_call_operand.vmem [shape: f32[64,1], index: 4, kind: input, shape index: {}]   ;;  %s1110_s5 = inlined_call_operand.vmem [shape: bf16[64,64], index: 5, kind: input, shape index: {}]   ;;  %s1111_s6 = inlined_call_operand.vmem [shape: f32[64,1], index: 6, kind: input, shape index: {}]   ;;  %s1112_s7 = inlined_call_operand.vmem [shape: f32[64,1], index: 7, kind: input, shape index: {}]   ;;  %s1113_s8 = inlined_call_operand.<no memory space> [shape: f32[1,1], index: 8, kind: input, shape index: {}]   ;;  %s1114_s9 = inlined_call_operand.hbm [shape: f32[1,128], index: 9, kind: output, shape index: {}]  }
   0x1   :  { %v35_v0 = vld [vmem:[%s1105_s0] sm:$0xff]  ;;  %v36_v1 = vld [vmem:[%s1105_s0 + $0x8] sm:$0xff]  ;;  %v37_v2 = vld [vmem:[%s1105_s0 + $0x10] sm:$0xff]  ;;  %788 = vset.pattern.permute.xlu0 %v830_v5  ;;  %789 = vset.pattern.permute.xlu1 %v830_v5 }
   0x2   :  { %v51_v3 = vpack.c.bf16 %v36_v1, %v35_v0  ;;  %v38_v4 = vld [vmem:[%s1105_s0 + $0x18] sm:$0xff]  ;;  %v39_v8 = vld [vmem:[%s1105_s0 + $0x20] sm:$0xff]  ;;  %v40_v9 = vld [vmem:[%s1105_s0 + $0x28] sm:$0xff] }
   0x3   :  { %v52_v6 = vpack.c.bf16 %v38_v4, %v37_v2  ;;  %v790_v10 = vld [vmem:[%s1106_s1] sm:$0xff]   ;;  %v53_v12 = vpack.c.bf16 %v40_v9, %v39_v8  ;;  %v69_v14 = vld [vmem:[%s1107_s2 + $0x10] sm:$0xff]  ;;  %v68_v15 = vld [vmem:[%s1107_s2 + $0x8] sm:$0xff] }
   0x4   :  { %778 = vmatprep.subr.msk.bf16.mxu0 %vm135_vm0, %v51_v3  ;;  %v149_v7 = vsel %vm135_vm0, %v51_v3, 0  ;;  %738 = vmatprep.mubr.msk.bf16.mxu0 %vm135_vm0, %v790_v10  ;;  %v67_v13 = vld [vmem:[%s1107_s2] sm:$0xff]  ;;  %v70_v16 = vld [vmem:[%s1107_s2 + $0x18] sm:$0xff]  ;;  %v41_v17 = vld [vmem:[%s1105_s0 + $0x30] sm:$0xff] }
   0x5   :  { %723 = vmatpush3.bf16.xpose.msra.mxu0 %v149_v7  ;;  %v152_v11 = vsel %vm135_vm0, %v52_v6, 0  ;;  %77 = vperm.xlu0 %788, %v67_v13   ;;  %v42_v18 = vld [vmem:[%s1105_s0 + $0x38] sm:$0xff]  ;;  %v71_v19 = vld [vmem:[%s1107_s2 + $0x20] sm:$0xff]  ;;  %v72_v20 = vld [vmem:[%s1107_s2 + $0x28] sm:$0xff]  ;;  %v155_v21 = vsel %vm135_vm0, %v53_v12, 0 }
   0x6   :  { %779 = vmatprep.subr.msk.bf16.mxu0 %vm135_vm0, %v52_v6  ;;  %87 = vperm.xlu1 %789, %v69_v14   ;;  %v54_v22 = vpack.c.bf16 %v42_v18, %v41_v17  ;;  %v73_v23 = vld [vmem:[%s1107_s2 + $0x30] sm:$0xff]  ;;  %v74_v24 = vld [vmem:[%s1107_s2 + $0x38] sm:$0xff]  ;;  %v43_v25 = vld [vmem:[%s1105_s0 + $0x40] sm:$0xff] }
   0x7   :  { %v44_v26 = vld [vmem:[%s1105_s0 + $0x48] sm:$0xff]  ;;  %v257_v27 = vld [vmem:[%s1109_s4] sm:$0xff] }
   0x8   :  { %v258_v28 = vld [vmem:[%s1109_s4 + $0x8] sm:$0xff]  ;;  %v158_v29 = vsel %vm135_vm0, %v54_v22, 0  ;;  %v55_v30 = vpack.c.bf16 %v44_v26, %v43_v25 }
   0x9   :  { %82 = vperm.xlu0 %788, %v68_v15  }
   0xa   :  { %92 = vperm.xlu1 %789, %v70_v16  }
   0xd   :  { %725 = vmatpush3.bf16.xpose.msra.mxu0 %v152_v11  ;;  %97 = vperm.xlu0 %788, %v71_v19  }
   0xe   :  { %780 = vmatprep.subr.msk.bf16.mxu0 %vm135_vm0, %v53_v12  ;;  %102 = vperm.xlu1 %789, %v72_v20  }
  0x11   :  { %107 = vperm.xlu0 %788, %v73_v23  }
  0x12   :  { %112 = vperm.xlu1 %789, %v74_v24  }
  0x15   :  { %727 = vmatpush3.bf16.xpose.msra.mxu0 %v155_v21 }
  0x16   :  { %781 = vmatprep.subr.msk.bf16.mxu0 %vm135_vm0, %v54_v22 }
  0x17   :  { %15 = vsyncpa [#allocation4], 0  ;;  %267 = vperm.xlu0 %788, %v257_v27   ;;  %272 = vperm.xlu1 %789, %v258_v28   ;;  %v259_v31 = vld [vmem:[%s1109_s4 + $0x10] sm:$0xff]  ;;  %v260_v32 = vld [vmem:[%s1109_s4 + $0x18] sm:$0xff]  ;;  %v161_v37 = vsel %vm135_vm0, %v55_v30, 0  ;;  %vm325_vm1 = vcmask 523264  }
  0x18   :  { %v45_v33 = vld [vmem:[%s1105_s0 + $0x50] sm:$0xff]  ;;  %v46_v34 = vld [vmem:[%s1105_s0 + $0x58] sm:$0xff]  ;;  %v261_v35 = vld [vmem:[%s1109_s4 + $0x20] sm:$0xff]  ;;  %s831_s12 = smov [#allocation3]  }
  0x19   :  { %v262_v36 = vld [vmem:[%s1109_s4 + $0x28] sm:$0xff]  ;;  %v56_v38 = vpack.c.bf16 %v46_v34, %v45_v33  ;;  %v263_v39 = vld [vmem:[%s1109_s4 + $0x30] sm:$0xff]  ;;  %v264_v40 = vld [vmem:[%s1109_s4 + $0x38] sm:$0xff]  ;;  %s661_s13 = sshll.u32 %s831_s12, 4  ;;  %s662_s13 = int_to_ptr.vmem [resolvable:$true] %s661_s13 }
  0x1a   :  { %v47_v41 = vld [vmem:[%s1105_s0 + $0x60] sm:$0xff]  ;;  %v48_v42 = vld [vmem:[%s1105_s0 + $0x68] sm:$0xff]  ;;  %v425_v47 = vld [vmem:[%s1111_s6 + $0x10] sm:$0xff]  ;;  %s806_s14 = scalar_lea.vmem %s662_s13, 16  ;;  %s810_s15 = scalar_lea.vmem %s662_s13, 32 }
  0x1b   :  { %277 = vperm.xlu0 %788, %v259_v31   ;;  %282 = vperm.xlu1 %789, %v260_v32   ;;  %v423_v43 = vld [vmem:[%s1111_s6] sm:$0xff]  ;;  %v424_v44 = vld [vmem:[%s1111_s6 + $0x8] sm:$0xff]  ;;  %v164_v45 = vsel %vm135_vm0, %v56_v38, 0  ;;  %v57_v46 = vpack.c.bf16 %v48_v42, %v47_v41  ;;  %v426_v48 = vld [vmem:[%s1111_s6 + $0x18] sm:$0xff]  ;;  %p807_p0 = scmp.ne.s32.totalorder %s662_s13, %s806_s14  ;;  %p811_p1 = scmp.lt.s32.totalorder %s662_s13, %s662_s13 }
  0x1c   :  { %v49_v49 = vld [vmem:[%s1105_s0 + $0x70] sm:$0xff]  ;;  %v50_v50 = vld [vmem:[%s1105_s0 + $0x78] sm:$0xff]  ;;  %v576_v51 = vld [vmem:[%s1112_s7] sm:$0xff]  ;;  %p812_p2 = scmp.lt.s32.totalorder %s810_s15, %s806_s14 }
  0x1d   :  { %729 = vmatpush3.bf16.xpose.msra.mxu0 %v158_v29  ;;  %v577_v52 = vld [vmem:[%s1112_s7 + $0x8] sm:$0xff]  ;;  %v167_v53 = vsel %vm135_vm0, %v57_v46, 0  ;;  %v58_v54 = vpack.c.bf16 %v50_v50, %v49_v49  ;;  %v427_v55 = vld [vmem:[%s1111_s6 + $0x20] sm:$0xff]  ;;  %v578_v56 = vld [vmem:[%s1112_s7 + $0x10] sm:$0xff] }
  0x1e   :  { %782 = vmatprep.subr.msk.bf16.mxu0 %vm135_vm0, %v55_v30  ;;  %v428_v57 = vld [vmem:[%s1111_s6 + $0x28] sm:$0xff]  ;;  %v579_v58 = vld [vmem:[%s1112_s7 + $0x18] sm:$0xff]  ;;  %v429_v60 = vld [vmem:[%s1111_s6 + $0x30] sm:$0xff]  ;;  %p813_p3 = por %p812_p2, %p811_p1 }
  0x1f   :  { %287 = vperm.xlu0 %788, %v261_v35   ;;  %292 = vperm.xlu1 %789, %v262_v36   ;;  %v170_v59 = vsel %vm135_vm0, %v58_v54, 0  ;;  %v580_v61 = vld [vmem:[%s1112_s7 + $0x20] sm:$0xff]  ;;  %v791_v62 = vld [vmem:[%s1106_s1 + $0x8] sm:$0xff]   ;;  %v430_v63 = vld [vmem:[%s1111_s6 + $0x38] sm:$0xff] }
  0x20   :  { %v581_v0 = vld [vmem:[%s1112_s7 + $0x28] sm:$0xff]  ;;  %v792_v1 = vld [vmem:[%s1106_s1 + $0x10] sm:$0xff]   ;;  %v583_v3 = vld [vmem:[%s1112_s7 + $0x38] sm:$0xff]  ;;  %p814_p4 = pnand %p813_p3, %p807_p0 }
  0x21   :  { %v582_v2 = vld [vmem:[%s1112_s7 + $0x30] sm:$0xff]  ;;  %v793_v4 = vld [vmem:[%s1106_s1 + $0x18] sm:$0xff]   ;;  %v794_v5 = vld [vmem:[%s1108_s3] sm:$0xff]  }
  0x22   :  { %754 = vmatprep.mubr.msk.bf16.mxu1 %vm325_vm1, %v794_v5  ;;  %v795_v42 = vld [vmem:[%s1108_s3 + $0x8] sm:$0xff]  }
  0x23   :  { %297 = vperm.xlu0 %788, %v263_v39   ;;  %302 = vperm.xlu1 %789, %v264_v40  }
  0x25   :  { %731 = vmatpush3.bf16.xpose.msra.mxu0 %v161_v37 }
  0x26   :  { %783 = vmatprep.subr.msk.bf16.mxu0 %vm135_vm0, %v56_v38 }
  0x27   :  { %433 = vperm.xlu0 %788, %v423_v43   ;;  %438 = vperm.xlu1 %789, %v424_v44   ;;  %v796_v43 = vld [vmem:[%s1108_s3 + $0x10] sm:$0xff]   ;;  %v797_v44 = vld [vmem:[%s1108_s3 + $0x18] sm:$0xff]  }
  0x2b   :  { %443 = vperm.xlu0 %788, %v425_v47   ;;  %448 = vperm.xlu1 %789, %v426_v48  }
  0x2d   :  { %733 = vmatpush3.bf16.xpose.msra.mxu0 %v164_v45  ;;  %v798_v45 = vld [vmem:[%s1110_s5] sm:$0xff]  }
  0x2e   :  { %784 = vmatprep.subr.msk.bf16.mxu0 %vm135_vm0, %v57_v46 }
  0x2f   :  { %586 = vperm.xlu0 %788, %v576_v51   ;;  %591 = vperm.xlu1 %789, %v577_v52  }
  0x33   :  { %453 = vperm.xlu0 %788, %v427_v55   ;;  %596 = vperm.xlu1 %789, %v578_v56  }
  0x35   :  { %735 = vmatpush3.bf16.xpose.msra.mxu0 %v167_v53 }
  0x36   :  { %785 = vmatprep.subr.msk.bf16.mxu0 %vm135_vm0, %v58_v54 }
  0x37   :  { %458 = vperm.xlu0 %788, %v428_v57   ;;  %601 = vperm.xlu1 %789, %v579_v58  }
  0x3b   :  { %463 = vperm.xlu0 %788, %v429_v60   ;;  %606 = vperm.xlu1 %789, %v580_v61  }
  0x3d   :  { %737 = vmatpush3.bf16.xpose.msra.mxu0 %v170_v59 }
  0x3f   :  { %468 = vperm.xlu0 %788, %v430_v63   ;;  %611 = vperm.xlu1 %789, %v581_v0  }
  0x43   :  { %616 = vperm.xlu0 %788, %v582_v2   ;;  %621 = vperm.xlu1 %789, %v583_v3  }
  0x44   :  { %739 = vmatmul.mubr.msk.bf16.vlgmr.msra.gmra.mrb[0].mxu0 %vm135_vm0, %v791_v62 }
  0x45   :  { %742 = vmatprep.mubr.msk.bf16.mxu0 %vm135_vm0, %v792_v1 }
  0x4c   :  { %743 = vmatmul.mubr.msk.bf16.gmra.mrb[4].mxu0 %vm135_vm0, %v793_v4 }
  0x84   :  { %v78_v6 = vpop.permute.xlu0 %77 }
  0x85   :  { %v88_v7 = vpop.permute.xlu1 %87 }
  0x88   :  { %v83_v8 = vpop.permute.xlu0 %82 }
  0x89   :  { %v93_v9 = vpop.permute.xlu1 %92 }
  0x8c   :  { %v98_v13 = vpop.permute.xlu0 %97 }
  0x8d   :  { %v103_v18 = vpop.permute.xlu1 %102 }
  0x90   :  { %v108_v25 = vpop.permute.xlu0 %107 }
  0x91   :  { %v113_v30 = vpop.permute.xlu1 %112 }
  0x96   :  { %v268_v46 = vpop.permute.xlu0 %267  ;;  %v273_v47 = vpop.permute.xlu1 %272 }
  0x9a   :  { %v278_v48 = vpop.permute.xlu0 %277  ;;  %v283_v49 = vpop.permute.xlu1 %282 }
  0x9e   :  { %v288_v53 = vpop.permute.xlu0 %287  ;;  %v293_v58 = vpop.permute.xlu1 %292 }
  0xa2   :  { %v298_v1 = vpop.permute.xlu0 %297 }
 0x117   :  { %v740_v10 = vpop.f32.mrb[0].mxu0 }
 0x118   :  { %v215_v11 = vadd.f32 %v740_v10, %v88_v7  ;;  %v206_v12 = vpop.f32.mrb[1].mxu0 }
 0x119   :  { %v207_v14 = vadd.f32 %v206_v12, %v78_v6  ;;  %v741_v15 = vpop.f32.mrb[2].mxu0  ;;  %v303_v6 = vpop.permute.xlu1 %302 }
 0x11a   :  { %v218_v16 = vadd.f32 %v741_v15, %v93_v9  ;;  %v209_v17 = vpop.f32.mrb[3].mxu0  ;;  %v239_v20 = vmax.f32 %v215_v11, 0.0 }
 0x11b   :  { %v210_v19 = vadd.f32 %v209_v17, %v83_v8  ;;  %v237_v22 = vmax.f32 %v207_v14, 0.0 }
 0x11c   :  { %v240_v21 = vmax.f32 %v218_v16, 0.0 }
 0x11d   :  { %v238_v23 = vmax.f32 %v210_v19, 0.0  ;;  %v800_v19 = vld [vmem:[%s1110_s5 + $0x10] sm:$0xff]  }
 0x11e   :  { %v254_v24 = vpack.c.bf16 %v240_v21, %v239_v20  ;;  %v801_v20 = vld [vmem:[%s1110_s5 + $0x18] sm:$0xff]   ;;  %v434_v21 = vpop.permute.xlu0 %433 }
 0x11f   :  { %v744_v26 = vpop.f32.mrb[4].mxu0  ;;  %v253_v27 = vpack.c.bf16 %v238_v23, %v237_v22  ;;  %v439_v22 = vpop.permute.xlu1 %438 }
 0x120   :  { %v231_v28 = vadd.f32 %v744_v26, %v108_v25  ;;  %v222_v29 = vpop.f32.mrb[5].mxu0 }
 0x121   :  { %v223_v31 = vadd.f32 %v222_v29, %v98_v13  ;;  %v745_v32 = vpop.f32.mrb[6].mxu0  ;;  %746 = vmatprep.subr.bf16.mxu1 %v253_v27 }
 0x122   :  { %v234_v33 = vadd.f32 %v745_v32, %v113_v30  ;;  %v225_v34 = vpop.f32.mrb[7].mxu0  ;;  %747 = vmatpush3.bf16.msra.mxu1 %v253_v27  ;;  %v243_v36 = vmax.f32 %v231_v28, 0.0  ;;  %v444_v23 = vpop.permute.xlu0 %443 }
 0x123   :  { %v226_v35 = vadd.f32 %v225_v34, %v103_v18  ;;  %748 = vmatprep.subr.bf16.mxu1 %v254_v24  ;;  %v241_v38 = vmax.f32 %v223_v31, 0.0  ;;  %v799_v18 = vld [vmem:[%s1110_s5 + $0x8] sm:$0xff]  }
 0x124   :  { %v244_v37 = vmax.f32 %v234_v33, 0.0 }
 0x125   :  { %v242_v39 = vmax.f32 %v226_v35, 0.0 }
 0x126   :  { %v256_v40 = vpack.c.bf16 %v244_v37, %v243_v36  ;;  %749 = vmatpush3.bf16.msra.mxu1 %v254_v24  ;;  %v449_v24 = vpop.permute.xlu1 %448  ;;  %v587_v25 = vpop.permute.xlu0 %586 }
 0x127   :  { %v255_v41 = vpack.c.bf16 %v242_v39, %v241_v38 }
 0x129   :  { %750 = vmatprep.subr.bf16.mxu1 %v255_v41 }
 0x12a   :  { %751 = vmatpush3.bf16.msra.mxu1 %v255_v41  ;;  %v592_v26 = vpop.permute.xlu1 %591  ;;  %v454_v27 = vpop.permute.xlu0 %453 }
 0x12b   :  { %752 = vmatprep.subr.bf16.mxu1 %v256_v40 }
 0x12e   :  { %753 = vmatpush3.bf16.msra.mxu1 %v256_v40  ;;  %v597_v28 = vpop.permute.xlu1 %596  ;;  %v459_v29 = vpop.permute.xlu0 %458 }
 0x131   :  { %755 = vmatmul.mubr.msk.bf16.vlgmr.msra.gmra.mrb[0].mxu1 %vm325_vm1, %v795_v42 }
 0x132   :  { %758 = vmatprep.mubr.msk.bf16.mxu1 %vm325_vm1, %v796_v43  ;;  %v602_v31 = vpop.permute.xlu1 %601  ;;  %v464_v40 = vpop.permute.xlu0 %463 }
 0x136   :  { %v607_v43 = vpop.permute.xlu1 %606 }
 0x139   :  { %759 = vmatmul.mubr.msk.bf16.gmra.mrb[4].mxu1 %vm325_vm1, %v797_v44 }
 0x13a   :  { %770 = vmatprep.mubr.msk.bf16.mxu1 %vm325_vm1, %v798_v45 }
 0x204   :  { %v756_v50 = vpop.f32.mrb[0].mxu1 }
 0x205   :  { %v381_v51 = vadd.f32 %v756_v50, %v278_v48  ;;  %v372_v52 = vpop.f32.mrb[1].mxu1 }
 0x206   :  { %v373_v54 = vadd.f32 %v372_v52, %v268_v46  ;;  %v757_v55 = vpop.f32.mrb[2].mxu1 }
 0x207   :  { %v384_v56 = vadd.f32 %v757_v55, %v283_v49  ;;  %v375_v57 = vpop.f32.mrb[3].mxu1  ;;  %v405_v60 = vmax.f32 %v381_v51, 0.0 }
 0x208   :  { %v376_v59 = vadd.f32 %v375_v57, %v273_v47  ;;  %v403_v62 = vmax.f32 %v373_v54, 0.0  ;;  %v469_v54 = vpop.permute.xlu0 %468 }
 0x209   :  { %v406_v61 = vmax.f32 %v384_v56, 0.0 }
 0x20a   :  { %v404_v63 = vmax.f32 %v376_v59, 0.0 }
 0x20b   :  { %v420_v0 = vpack.c.bf16 %v406_v61, %v405_v60  ;;  %v612_v61 = vpop.permute.xlu1 %611 }
 0x20c   :  { %v419_v2 = vpack.c.bf16 %v404_v63, %v403_v62  ;;  %v760_v3 = vpop.f32.mrb[4].mxu1 }
 0x20d   :  { %v397_v4 = vadd.f32 %v760_v3, %v298_v1  ;;  %v388_v5 = vpop.f32.mrb[5].mxu1 }
 0x20e   :  { %v389_v7 = vadd.f32 %v388_v5, %v288_v53  ;;  %v761_v8 = vpop.f32.mrb[6].mxu1  ;;  %762 = vmatprep.subr.bf16.mxu1 %v419_v2  ;;  %v617_v5 = vpop.permute.xlu0 %616 }
 0x20f   :  { %v400_v9 = vadd.f32 %v761_v8, %v303_v6  ;;  %v391_v10 = vpop.f32.mrb[7].mxu1  ;;  %763 = vmatpush3.bf16.msra.mxu1 %v419_v2  ;;  %v409_v12 = vmax.f32 %v397_v4, 0.0  ;;  %v622_v8 = vpop.permute.xlu1 %621 }
 0x210   :  { %v392_v11 = vadd.f32 %v391_v10, %v293_v58  ;;  %764 = vmatprep.subr.bf16.mxu1 %v420_v0  ;;  %v407_v14 = vmax.f32 %v389_v7, 0.0 }
 0x211   :  { %v410_v13 = vmax.f32 %v400_v9, 0.0 }
 0x212   :  { %v408_v15 = vmax.f32 %v392_v11, 0.0 }
 0x213   :  { %v422_v16 = vpack.c.bf16 %v410_v13, %v409_v12  ;;  %765 = vmatpush3.bf16.msra.mxu1 %v420_v0 }
 0x214   :  { %v421_v17 = vpack.c.bf16 %v408_v15, %v407_v14 }
 0x216   :  { %766 = vmatprep.subr.bf16.mxu1 %v421_v17 }
 0x217   :  { %767 = vmatpush3.bf16.msra.mxu1 %v421_v17  ;;  %v646_v17 = vstv %s1113_s8 }
 0x218   :  { %768 = vmatprep.subr.bf16.mxu1 %v422_v16 }
 0x21b   :  { %769 = vmatpush3.bf16.msra.mxu1 %v422_v16 }
 0x21e   :  { %771 = vmatmul.mubr.msk.bf16.vlgmr.msra.gmra.mrb[8].mxu1 %vm325_vm1, %v799_v18 }
 0x21f   :  { %774 = vmatprep.mubr.msk.bf16.mxu1 %vm325_vm1, %v800_v19 }
 0x226   :  { %775 = vmatmul.mubr.msk.bf16.gmra.mrb[12].mxu1 %vm325_vm1, %v801_v20 }
 0x2f1   :  { %v772_v30 = vpop.f32.mrb[8].mxu1 }
 0x2f2   :  { %v537_v32 = vpop.f32.mrb[9].mxu1  ;;  %v546_v33 = vadd.f32 %v772_v30, %v444_v23 }
 0x2f3   :  { %v538_v34 = vadd.f32 %v537_v32, %v434_v21  ;;  %v773_v35 = vpop.f32.mrb[10].mxu1 }
 0x2f4   :  { %v549_v36 = vadd.f32 %v773_v35, %v449_v24  ;;  %v540_v37 = vpop.f32.mrb[11].mxu1  ;;  %v570_v41 = vmax.f32 %v546_v33, 0.0 }
 0x2f5   :  { %v568_v38 = vmax.f32 %v538_v34, 0.0  ;;  %v541_v39 = vadd.f32 %v540_v37, %v439_v22 }
 0x2f6   :  { %v571_v44 = vmax.f32 %v549_v36, 0.0  ;;  %v626_v49 = vmul.f32 %v597_v28, %v570_v41 }
 0x2f7   :  { %v569_v42 = vmax.f32 %v541_v39, 0.0  ;;  %v624_v45 = vmul.f32 %v587_v25, %v568_v38 }
 0x2f8   :  { %v627_v55 = vmul.f32 %v602_v31, %v571_v44 }
 0x2f9   :  { %v625_v46 = vmul.f32 %v592_v26, %v569_v42  ;;  %v776_v47 = vpop.f32.mrb[12].mxu1 }
 0x2fa   :  { %v553_v48 = vpop.f32.mrb[13].mxu1  ;;  %v562_v51 = vadd.f32 %v776_v47, %v464_v40 }
 0x2fb   :  { %v632_v50 = vadd.f32 %v625_v46, %v624_v45  ;;  %v554_v52 = vadd.f32 %v553_v48, %v454_v27  ;;  %v777_v53 = vpop.f32.mrb[14].mxu1 }
 0x2fc   :  { %v556_v56 = vpop.f32.mrb[15].mxu1  ;;  %v565_v59 = vadd.f32 %v777_v53, %v469_v54  ;;  %v574_v62 = vmax.f32 %v562_v51, 0.0 }
 0x2fd   :  { %v633_v57 = vadd.f32 %v632_v50, %v626_v49  ;;  %v572_v58 = vmax.f32 %v554_v52, 0.0  ;;  %v557_v60 = vadd.f32 %v556_v56, %v459_v29 }
 0x2fe   :  { %v575_v3 = vmax.f32 %v565_v59, 0.0  ;;  %v630_v6 = vmul.f32 %v617_v5, %v574_v62 }
 0x2ff   :  { %v628_v63 = vmul.f32 %v607_v43, %v572_v58  ;;  %v634_v0 = vadd.f32 %v633_v57, %v627_v55  ;;  %v573_v1 = vmax.f32 %v557_v60, 0.0 }
 0x300   :  { %v631_v9 = vmul.f32 %v622_v8, %v575_v3 }
 0x301   :  { %v635_v2 = vadd.f32 %v634_v0, %v628_v63  ;;  %v629_v4 = vmul.f32 %v612_v61, %v573_v1 }
 0x303   :  { %v636_v7 = vadd.f32 %v635_v2, %v629_v4 }
 0x305   :  { %v637_v10 = vadd.f32 %v636_v7, %v630_v6 }
 0x307   :  { %v638_v11 = vadd.f32 %v637_v10, %v631_v9 }
 0x309   :  { %v639_v12 = vrot.slane %v638_v11, 4 }
 0x30b   :  { %v640_v13 = vadd.f32 %v639_v12, %v638_v11 }
 0x30d   :  { %v641_v14 = vrot.slane %v640_v13, 2 }
 0x30f   :  { %v642_v15 = vadd.f32 %v641_v14, %v640_v13 }
 0x311   :  { %v643_v16 = vrot.slane %v642_v15, 1 }
 0x313   :  { %v644_v18 = vadd.f32 %v643_v16, %v642_v15 }
 0x315   :  { %v647_v19 = vadd.f32 %v646_v17, %v644_v18 }
 0x317   :  { %v693_v20 = vmul.f32 -1.442695, %v647_v19 }
 0x319   :  { %802 = vpow2.f32 %v693_v20 }
 0x323   :  { %v803_v21 = vpop.eup %802 }
 0x324   :  { %v651_v22 = vadd.f32 1.0, %v803_v21 }
 0x326   :  { %804 = vrcp.f32 %v651_v22 }
 0x330   :  { %v805_v23 = vpop.eup %804 }
 0x331   :  { %654 = vst [vmem:[#allocation3] sm:$0x1] %v805_v23 }
 0x332   :  { %817 = shalt.err (!%p814_p4)
}
 0x333   :  { %s818_s17 = scalar_lea.hbm %s1114_s9, 16 }
 0x334   :  { %p819_p5 = scmp.ne.s32.totalorder %s1114_s9, %s818_s17  ;;  %p822_p6 = scmp.lt.u32.totalorder %s818_s17, %s1114_s9 }
 0x336   :  { %p824_p7 = pnand %p822_p6, %p819_p5 }
 0x338   :  { %827 = shalt.err (!%p824_p7)
}
 0x339   :  { %664 = dma.vmem_to_hbm [thread:$0]  %s662_s13, 16, %s1114_s9, [#allocation4]  }
 0x33a   :  { %828 = dma.done.wait [#allocation4], 16  }
 0x33b   :  { %829 = vsyncadd [#allocation4], 4294967280 }
 0x33c   :  { %668 = vsyncpa [#allocation4], 1 }

</bundles_post_ra>
